<compile_context>
chip_gen: v6e
topology: v6e:2x2x1
jax: 0.10.0
libtpu: 0.0.40
codegen_flags: <defaults>
</compile_context>

<pallas_src>
import functools

import jax
import jax.numpy as jnp
from jax.experimental import pallas as pl
from jax.experimental.pallas import tpu as pltpu


def _round_up(x, m):
    return ((x + m - 1) // m) * m


def _gather_tile_kernel(ids_ref, emb_ref, out_ref, copy_sems, *,
                        tile_n, vocab_size, n_inflight):
    """Gather `tile_n` embedding rows into the (tile_n, D) output tile.

    ids_ref:   SMEM scalar-prefetch ref with the flat (padded) token ids.
    emb_ref:   embedding table — raw HBM ref (pl.ANY) or a fully VMEM-resident
               block (small-table fast path).
    out_ref:   (tile_n, D) VMEM output tile; rows are written by DMA.
    copy_sems: (n_inflight,) DMA semaphores — n_inflight row copies in flight.
    """
    base = pl.program_id(0) * tile_n
    sem_mask = n_inflight - 1  # n_inflight is a power of two

    def row_copy(j):
        tok = ids_ref[base + j]
        # Bounds-safe: never DMA outside the table, even for bad ids.
        tok = jnp.minimum(jnp.maximum(tok, 0), vocab_size - 1)
        return pltpu.make_async_copy(
            emb_ref.at[pl.ds(tok, 1), :],
            out_ref.at[pl.ds(j, 1), :],
            copy_sems.at[j & sem_mask],
        )

    n_prime = min(n_inflight, tile_n)

    # Prime: put the first n_prime row fetches in flight (short, fixed count).
    @pl.loop(0, n_prime, unroll=True)
    def _prime(j):
        row_copy(j).start()

    # Retire row j, then reuse its semaphore slot for row j + n_inflight.
    @pl.loop(0, tile_n)
    def _drain(j):
        row_copy(j).wait()

        @pl.when(j + n_inflight < tile_n)
        def _():
            row_copy(j + n_inflight).start()


def word_embedding_forward(x, emb, *, tile_n=256, n_inflight=8,
                           resident_max_bytes=4 * 1024 * 1024,
                           force_hbm=False):
    """x: [B, S] int token ids; emb: [V, D] table -> [B, S, D] embeddings."""
    assert n_inflight > 0 and (n_inflight & (n_inflight - 1)) == 0, \
        "n_inflight must be a power of two"
    B, S = x.shape
    V, D = emb.shape
    N = B * S

    # Tile size: multiple of 8 sublanes (dense stores); shrink for tiny N.
    if N < tile_n:
        tile_n = max(8, _round_up(N, 8))
    n_pad = _round_up(N, tile_n)
    num_tiles = n_pad // tile_n

    # Pad ids with 0 (always a valid row); padded output rows are sliced off.
    ids_flat = jnp.pad(x.reshape(N).astype(jnp.int32), (0, n_pad - N))

    table_bytes = V * D * emb.dtype.itemsize
    resident = (not force_hbm) and table_bytes <= resident_max_bytes
    if resident:
        # Small-table fast path: whole table resident in VMEM (same block every
        # step => fetched from HBM once); rows then copied at VMEM bandwidth.
        emb_spec = pl.BlockSpec((V, D), lambda i, ids: (0, 0))
    else:
        # General path: table stays in HBM; kernel DMAs rows on demand.
        emb_spec = pl.BlockSpec(memory_space=pl.ANY)

    kernel = functools.partial(
        _gather_tile_kernel,
        tile_n=tile_n, vocab_size=V, n_inflight=n_inflight)

    grid_spec = pltpu.PrefetchScalarGridSpec(
        num_scalar_prefetch=1,            # ids land in SMEM for scalar reads
        grid=(num_tiles,),
        in_specs=[emb_spec],
        out_specs=pl.BlockSpec((tile_n, D), lambda i, ids: (i, 0)),
        scratch_shapes=[pltpu.SemaphoreType.DMA((n_inflight,))],
    )

    out_flat = pl.pallas_call(
        kernel,
        grid_spec=grid_spec,
        out_shape=jax.ShapeDtypeStruct((n_pad, D), emb.dtype),
        compiler_params=pltpu.CompilerParams(
            dimension_semantics=("parallel",),   # token tiles are independent
            vmem_limit_bytes=32 * 1024 * 1024,
        ),
    )(ids_flat, emb)

    return out_flat[:N].reshape(B, S, D)


def init_embedding(vocab_size, emb_dim, padding_idx=0, seed=0):
    """Deterministic nn.Embedding-style init; row `padding_idx` zeroed."""
    key = jax.random.PRNGKey(seed)
    emb = jax.random.normal(key, (vocab_size, emb_dim), dtype=jnp.float32)
    emb = emb.at[padding_idx].set(0.0)
    return emb


# TODO(synk): padding_idx only masks gradients for that row during training;
# the forward pass (implemented here) is an unmodified table lookup.

if __name__ == "__main__":
    vocab_size = 64
    emb_dim = 128
    B, S = 2, 8
    padding_idx = 0

    emb = init_embedding(vocab_size, emb_dim, padding_idx=padding_idx, seed=0)

    key = jax.random.PRNGKey(0)
    x = jax.random.randint(key, (B, S), minval=0, maxval=vocab_size,
                           dtype=jnp.int32)
    # Force a few padding tokens to exercise the padding_idx row.
    x = x.at[0, 0].set(padding_idx)
    x = x.at[1, -1].set(padding_idx)

    ref = jnp.take(emb, x, axis=0)

    # Small-table fast path (table VMEM-resident).
    out_resident = jax.block_until_ready(word_embedding_forward(x, emb))
    # General path (table left in HBM, per-row DMAs) — exercised explicitly.
    out_hbm = jax.block_until_ready(
        word_embedding_forward(x, emb, force_hbm=True))

    for out in (out_resident, out_hbm):
        assert out.shape == (B, S, emb_dim)
        assert jnp.allclose(out, ref), "mismatch vs reference gather"

    print("KERNEL_OK")
</pallas_src>

<mosaic_0001>
module attributes {stable_mosaic.version = 11 : i64} {
  func.func @_gather_tile_kernel(%arg0: i32, %arg1: memref<16xi32, #tpu.memory_space<smem>>, %arg2: memref<64x128xf32, #tpu.memory_space<vmem>>, %arg3: memref<16x128xf32, #tpu.memory_space<vmem>>, %arg4: memref<8x!tpu.dma_semaphore, #tpu.memory_space<semaphore_mem>>) attributes {dimension_semantics = [#tpu.dimension_semantics<parallel>], iteration_bounds = array<i64: 1>, scalar_prefetch = 1 : i64, scratch_operands = 1 : i64, tpu.core_type = #tpu.core_type<tc>, window_params = [{pipeline_mode = #tpu.pipeline_mode<synchronous>, transform_indices = @transform_0, window_bounds = array<i64: 64, 128>}, {transform_indices = @transform_1, window_bounds = array<i64: 16, 128>}]} {
    %c16_i32 = arith.constant 16 : i32
    %0 = arith.muli %arg0, %c16_i32 : i32
    %c0_i32 = arith.constant 0 : i32
    %c1_i32 = arith.constant 1 : i32
    %1 = arith.muli %c0_i32, %c1_i32 : i32
    %c0_i32_0 = arith.constant 0 : i32
    %2 = arith.addi %c0_i32_0, %1 : i32
    %3 = arith.addi %0, %2 : i32
    %4 = arith.index_cast %3 : i32 to index
    %5 = memref.load %arg1[%4] : memref<16xi32, #tpu.memory_space<smem>>
    %c0_i32_1 = arith.constant 0 : i32
    %6 = arith.maxsi %5, %c0_i32_1 : i32
    %c63_i32 = arith.constant 63 : i32
    %7 = arith.minsi %6, %c63_i32 : i32
    %c7_i32 = arith.constant 7 : i32
    %8 = arith.andi %2, %c7_i32 : i32
    %c0_i32_2 = arith.constant 0 : i32
    %9 = tpu.memref_slice %arg2[%7, %c0_i32_2] : memref<64x128xf32, #tpu.memory_space<vmem>> -> memref<1x128xf32, #tpu.memory_space<vmem>>
    %c0_i32_3 = arith.constant 0 : i32
    %10 = tpu.memref_slice %arg3[%2, %c0_i32_3] : memref<16x128xf32, #tpu.memory_space<vmem>> -> memref<1x128xf32, #tpu.memory_space<vmem>>
    %11 = tpu.memref_slice %arg4[%8] : memref<8x!tpu.dma_semaphore, #tpu.memory_space<semaphore_mem>> -> memref<1x!tpu.dma_semaphore, #tpu.memory_space<semaphore_mem>>
    %12 = tpu.memref_squeeze %11 : memref<1x!tpu.dma_semaphore, #tpu.memory_space<semaphore_mem>> -> memref<!tpu.dma_semaphore, #tpu.memory_space<semaphore_mem>>
    tpu.enqueue_dma source(%9 : memref<1x128xf32, #tpu.memory_space<vmem>>) target(%10 : memref<1x128xf32, #tpu.memory_space<vmem>>) target_semaphore(%12 : memref<!tpu.dma_semaphore, #tpu.memory_space<semaphore_mem>>)
    %c1_i32_4 = arith.constant 1 : i32
    %c1_i32_5 = arith.constant 1 : i32
    %13 = arith.muli %c1_i32_4, %c1_i32_5 : i32
    %c0_i32_6 = arith.constant 0 : i32
    %14 = arith.addi %c0_i32_6, %13 : i32
    %15 = arith.addi %0, %14 : i32
    %16 = arith.index_cast %15 : i32 to index
    %17 = memref.load %arg1[%16] : memref<16xi32, #tpu.memory_space<smem>>
    %c0_i32_7 = arith.constant 0 : i32
    %18 = arith.maxsi %17, %c0_i32_7 : i32
    %c63_i32_8 = arith.constant 63 : i32
    %19 = arith.minsi %18, %c63_i32_8 : i32
    %c7_i32_9 = arith.constant 7 : i32
    %20 = arith.andi %14, %c7_i32_9 : i32
    %c0_i32_10 = arith.constant 0 : i32
    %21 = tpu.memref_slice %arg2[%19, %c0_i32_10] : memref<64x128xf32, #tpu.memory_space<vmem>> -> memref<1x128xf32, #tpu.memory_space<vmem>>
    %c0_i32_11 = arith.constant 0 : i32
    %22 = tpu.memref_slice %arg3[%14, %c0_i32_11] : memref<16x128xf32, #tpu.memory_space<vmem>> -> memref<1x128xf32, #tpu.memory_space<vmem>>
    %23 = tpu.memref_slice %arg4[%20] : memref<8x!tpu.dma_semaphore, #tpu.memory_space<semaphore_mem>> -> memref<1x!tpu.dma_semaphore, #tpu.memory_space<semaphore_mem>>
    %24 = tpu.memref_squeeze %23 : memref<1x!tpu.dma_semaphore, #tpu.memory_space<semaphore_mem>> -> memref<!tpu.dma_semaphore, #tpu.memory_space<semaphore_mem>>
    tpu.enqueue_dma source(%21 : memref<1x128xf32, #tpu.memory_space<vmem>>) target(%22 : memref<1x128xf32, #tpu.memory_space<vmem>>) target_semaphore(%24 : memref<!tpu.dma_semaphore, #tpu.memory_space<semaphore_mem>>)
    %c2_i32 = arith.constant 2 : i32
    %c1_i32_12 = arith.constant 1 : i32
    %25 = arith.muli %c2_i32, %c1_i32_12 : i32
    %c0_i32_13 = arith.constant 0 : i32
    %26 = arith.addi %c0_i32_13, %25 : i32
    %27 = arith.addi %0, %26 : i32
    %28 = arith.index_cast %27 : i32 to index
    %29 = memref.load %arg1[%28] : memref<16xi32, #tpu.memory_space<smem>>
    %c0_i32_14 = arith.constant 0 : i32
    %30 = arith.maxsi %29, %c0_i32_14 : i32
    %c63_i32_15 = arith.constant 63 : i32
    %31 = arith.minsi %30, %c63_i32_15 : i32
    %c7_i32_16 = arith.constant 7 : i32
    %32 = arith.andi %26, %c7_i32_16 : i32
    %c0_i32_17 = arith.constant 0 : i32
    %33 = tpu.memref_slice %arg2[%31, %c0_i32_17] : memref<64x128xf32, #tpu.memory_space<vmem>> -> memref<1x128xf32, #tpu.memory_space<vmem>>
    %c0_i32_18 = arith.constant 0 : i32
    %34 = tpu.memref_slice %arg3[%26, %c0_i32_18] : memref<16x128xf32, #tpu.memory_space<vmem>> -> memref<1x128xf32, #tpu.memory_space<vmem>>
    %35 = tpu.memref_slice %arg4[%32] : memref<8x!tpu.dma_semaphore, #tpu.memory_space<semaphore_mem>> -> memref<1x!tpu.dma_semaphore, #tpu.memory_space<semaphore_mem>>
    %36 = tpu.memref_squeeze %35 : memref<1x!tpu.dma_semaphore, #tpu.memory_space<semaphore_mem>> -> memref<!tpu.dma_semaphore, #tpu.memory_space<semaphore_mem>>
    tpu.enqueue_dma source(%33 : memref<1x128xf32, #tpu.memory_space<vmem>>) target(%34 : memref<1x128xf32, #tpu.memory_space<vmem>>) target_semaphore(%36 : memref<!tpu.dma_semaphore, #tpu.memory_space<semaphore_mem>>)
    %c3_i32 = arith.constant 3 : i32
    %c1_i32_19 = arith.constant 1 : i32
    %37 = arith.muli %c3_i32, %c1_i32_19 : i32
    %c0_i32_20 = arith.constant 0 : i32
    %38 = arith.addi %c0_i32_20, %37 : i32
    %39 = arith.addi %0, %38 : i32
    %40 = arith.index_cast %39 : i32 to index
    %41 = memref.load %arg1[%40] : memref<16xi32, #tpu.memory_space<smem>>
    %c0_i32_21 = arith.constant 0 : i32
    %42 = arith.maxsi %41, %c0_i32_21 : i32
    %c63_i32_22 = arith.constant 63 : i32
    %43 = arith.minsi %42, %c63_i32_22 : i32
    %c7_i32_23 = arith.constant 7 : i32
    %44 = arith.andi %38, %c7_i32_23 : i32
    %c0_i32_24 = arith.constant 0 : i32
    %45 = tpu.memref_slice %arg2[%43, %c0_i32_24] : memref<64x128xf32, #tpu.memory_space<vmem>> -> memref<1x128xf32, #tpu.memory_space<vmem>>
    %c0_i32_25 = arith.constant 0 : i32
    %46 = tpu.memref_slice %arg3[%38, %c0_i32_25] : memref<16x128xf32, #tpu.memory_space<vmem>> -> memref<1x128xf32, #tpu.memory_space<vmem>>
    %47 = tpu.memref_slice %arg4[%44] : memref<8x!tpu.dma_semaphore, #tpu.memory_space<semaphore_mem>> -> memref<1x!tpu.dma_semaphore, #tpu.memory_space<semaphore_mem>>
    %48 = tpu.memref_squeeze %47 : memref<1x!tpu.dma_semaphore, #tpu.memory_space<semaphore_mem>> -> memref<!tpu.dma_semaphore, #tpu.memory_space<semaphore_mem>>
    tpu.enqueue_dma source(%45 : memref<1x128xf32, #tpu.memory_space<vmem>>) target(%46 : memref<1x128xf32, #tpu.memory_space<vmem>>) target_semaphore(%48 : memref<!tpu.dma_semaphore, #tpu.memory_space<semaphore_mem>>)
    %c4_i32 = arith.constant 4 : i32
    %c1_i32_26 = arith.constant 1 : i32
    %49 = arith.muli %c4_i32, %c1_i32_26 : i32
    %c0_i32_27 = arith.constant 0 : i32
    %50 = arith.addi %c0_i32_27, %49 : i32
    %51 = arith.addi %0, %50 : i32
    %52 = arith.index_cast %51 : i32 to index
    %53 = memref.load %arg1[%52] : memref<16xi32, #tpu.memory_space<smem>>
    %c0_i32_28 = arith.constant 0 : i32
    %54 = arith.maxsi %53, %c0_i32_28 : i32
    %c63_i32_29 = arith.constant 63 : i32
    %55 = arith.minsi %54, %c63_i32_29 : i32
    %c7_i32_30 = arith.constant 7 : i32
    %56 = arith.andi %50, %c7_i32_30 : i32
    %c0_i32_31 = arith.constant 0 : i32
    %57 = tpu.memref_slice %arg2[%55, %c0_i32_31] : memref<64x128xf32, #tpu.memory_space<vmem>> -> memref<1x128xf32, #tpu.memory_space<vmem>>
    %c0_i32_32 = arith.constant 0 : i32
    %58 = tpu.memref_slice %arg3[%50, %c0_i32_32] : memref<16x128xf32, #tpu.memory_space<vmem>> -> memref<1x128xf32, #tpu.memory_space<vmem>>
    %59 = tpu.memref_slice %arg4[%56] : memref<8x!tpu.dma_semaphore, #tpu.memory_space<semaphore_mem>> -> memref<1x!tpu.dma_semaphore, #tpu.memory_space<semaphore_mem>>
    %60 = tpu.memref_squeeze %59 : memref<1x!tpu.dma_semaphore, #tpu.memory_space<semaphore_mem>> -> memref<!tpu.dma_semaphore, #tpu.memory_space<semaphore_mem>>
    tpu.enqueue_dma source(%57 : memref<1x128xf32, #tpu.memory_space<vmem>>) target(%58 : memref<1x128xf32, #tpu.memory_space<vmem>>) target_semaphore(%60 : memref<!tpu.dma_semaphore, #tpu.memory_space<semaphore_mem>>)
    %c5_i32 = arith.constant 5 : i32
    %c1_i32_33 = arith.constant 1 : i32
    %61 = arith.muli %c5_i32, %c1_i32_33 : i32
    %c0_i32_34 = arith.constant 0 : i32
    %62 = arith.addi %c0_i32_34, %61 : i32
    %63 = arith.addi %0, %62 : i32
    %64 = arith.index_cast %63 : i32 to index
    %65 = memref.load %arg1[%64] : memref<16xi32, #tpu.memory_space<smem>>
    %c0_i32_35 = arith.constant 0 : i32
    %66 = arith.maxsi %65, %c0_i32_35 : i32
    %c63_i32_36 = arith.constant 63 : i32
    %67 = arith.minsi %66, %c63_i32_36 : i32
    %c7_i32_37 = arith.constant 7 : i32
    %68 = arith.andi %62, %c7_i32_37 : i32
    %c0_i32_38 = arith.constant 0 : i32
    %69 = tpu.memref_slice %arg2[%67, %c0_i32_38] : memref<64x128xf32, #tpu.memory_space<vmem>> -> memref<1x128xf32, #tpu.memory_space<vmem>>
    %c0_i32_39 = arith.constant 0 : i32
    %70 = tpu.memref_slice %arg3[%62, %c0_i32_39] : memref<16x128xf32, #tpu.memory_space<vmem>> -> memref<1x128xf32, #tpu.memory_space<vmem>>
    %71 = tpu.memref_slice %arg4[%68] : memref<8x!tpu.dma_semaphore, #tpu.memory_space<semaphore_mem>> -> memref<1x!tpu.dma_semaphore, #tpu.memory_space<semaphore_mem>>
    %72 = tpu.memref_squeeze %71 : memref<1x!tpu.dma_semaphore, #tpu.memory_space<semaphore_mem>> -> memref<!tpu.dma_semaphore, #tpu.memory_space<semaphore_mem>>
    tpu.enqueue_dma source(%69 : memref<1x128xf32, #tpu.memory_space<vmem>>) target(%70 : memref<1x128xf32, #tpu.memory_space<vmem>>) target_semaphore(%72 : memref<!tpu.dma_semaphore, #tpu.memory_space<semaphore_mem>>)
    %c6_i32 = arith.constant 6 : i32
    %c1_i32_40 = arith.constant 1 : i32
    %73 = arith.muli %c6_i32, %c1_i32_40 : i32
    %c0_i32_41 = arith.constant 0 : i32
    %74 = arith.addi %c0_i32_41, %73 : i32
    %75 = arith.addi %0, %74 : i32
    %76 = arith.index_cast %75 : i32 to index
    %77 = memref.load %arg1[%76] : memref<16xi32, #tpu.memory_space<smem>>
    %c0_i32_42 = arith.constant 0 : i32
    %78 = arith.maxsi %77, %c0_i32_42 : i32
    %c63_i32_43 = arith.constant 63 : i32
    %79 = arith.minsi %78, %c63_i32_43 : i32
    %c7_i32_44 = arith.constant 7 : i32
    %80 = arith.andi %74, %c7_i32_44 : i32
    %c0_i32_45 = arith.constant 0 : i32
    %81 = tpu.memref_slice %arg2[%79, %c0_i32_45] : memref<64x128xf32, #tpu.memory_space<vmem>> -> memref<1x128xf32, #tpu.memory_space<vmem>>
    %c0_i32_46 = arith.constant 0 : i32
    %82 = tpu.memref_slice %arg3[%74, %c0_i32_46] : memref<16x128xf32, #tpu.memory_space<vmem>> -> memref<1x128xf32, #tpu.memory_space<vmem>>
    %83 = tpu.memref_slice %arg4[%80] : memref<8x!tpu.dma_semaphore, #tpu.memory_space<semaphore_mem>> -> memref<1x!tpu.dma_semaphore, #tpu.memory_space<semaphore_mem>>
    %84 = tpu.memref_squeeze %83 : memref<1x!tpu.dma_semaphore, #tpu.memory_space<semaphore_mem>> -> memref<!tpu.dma_semaphore, #tpu.memory_space<semaphore_mem>>
    tpu.enqueue_dma source(%81 : memref<1x128xf32, #tpu.memory_space<vmem>>) target(%82 : memref<1x128xf32, #tpu.memory_space<vmem>>) target_semaphore(%84 : memref<!tpu.dma_semaphore, #tpu.memory_space<semaphore_mem>>)
    %c7_i32_47 = arith.constant 7 : i32
    %c1_i32_48 = arith.constant 1 : i32
    %85 = arith.muli %c7_i32_47, %c1_i32_48 : i32
    %c0_i32_49 = arith.constant 0 : i32
    %86 = arith.addi %c0_i32_49, %85 : i32
    %87 = arith.addi %0, %86 : i32
    %88 = arith.index_cast %87 : i32 to index
    %89 = memref.load %arg1[%88] : memref<16xi32, #tpu.memory_space<smem>>
    %c0_i32_50 = arith.constant 0 : i32
    %90 = arith.maxsi %89, %c0_i32_50 : i32
    %c63_i32_51 = arith.constant 63 : i32
    %91 = arith.minsi %90, %c63_i32_51 : i32
    %c7_i32_52 = arith.constant 7 : i32
    %92 = arith.andi %86, %c7_i32_52 : i32
    %c0_i32_53 = arith.constant 0 : i32
    %93 = tpu.memref_slice %arg2[%91, %c0_i32_53] : memref<64x128xf32, #tpu.memory_space<vmem>> -> memref<1x128xf32, #tpu.memory_space<vmem>>
    %c0_i32_54 = arith.constant 0 : i32
    %94 = tpu.memref_slice %arg3[%86, %c0_i32_54] : memref<16x128xf32, #tpu.memory_space<vmem>> -> memref<1x128xf32, #tpu.memory_space<vmem>>
    %95 = tpu.memref_slice %arg4[%92] : memref<8x!tpu.dma_semaphore, #tpu.memory_space<semaphore_mem>> -> memref<1x!tpu.dma_semaphore, #tpu.memory_space<semaphore_mem>>
    %96 = tpu.memref_squeeze %95 : memref<1x!tpu.dma_semaphore, #tpu.memory_space<semaphore_mem>> -> memref<!tpu.dma_semaphore, #tpu.memory_space<semaphore_mem>>
    tpu.enqueue_dma source(%93 : memref<1x128xf32, #tpu.memory_space<vmem>>) target(%94 : memref<1x128xf32, #tpu.memory_space<vmem>>) target_semaphore(%96 : memref<!tpu.dma_semaphore, #tpu.memory_space<semaphore_mem>>)
    %c8_i32 = arith.constant 8 : i32
    %c0_i32_55 = arith.constant 0 : i32
    %c16_i32_56 = arith.constant 16 : i32
    %97 = arith.addi %c0_i32_55, %c16_i32_56 : i32
    %c1_i32_57 = arith.constant 1 : i32
    scf.for %arg5 = %c0_i32_55 to %97 step %c1_i32_57  : i32 {
      %c1_i32_59 = arith.constant 1 : i32
      %98 = arith.muli %arg5, %c1_i32_59 : i32
      %c0_i32_60 = arith.constant 0 : i32
      %99 = arith.addi %c0_i32_60, %98 : i32
      %100 = arith.addi %0, %99 : i32
      %101 = arith.index_cast %100 : i32 to index
      %102 = memref.load %arg1[%101] : memref<16xi32, #tpu.memory_space<smem>>
      %c0_i32_61 = arith.constant 0 : i32
      %103 = arith.maxsi %102, %c0_i32_61 : i32
      %c63_i32_62 = arith.constant 63 : i32
      %104 = arith.minsi %103, %c63_i32_62 : i32
      %c7_i32_63 = arith.constant 7 : i32
      %105 = arith.andi %99, %c7_i32_63 : i32
      %c0_i32_64 = arith.constant 0 : i32
      %106 = tpu.memref_slice %arg2[%104, %c0_i32_64] : memref<64x128xf32, #tpu.memory_space<vmem>> -> memref<1x128xf32, #tpu.memory_space<vmem>>
      %c0_i32_65 = arith.constant 0 : i32
      %107 = tpu.memref_slice %arg3[%99, %c0_i32_65] : memref<16x128xf32, #tpu.memory_space<vmem>> -> memref<1x128xf32, #tpu.memory_space<vmem>>
      %108 = tpu.memref_slice %arg4[%105] : memref<8x!tpu.dma_semaphore, #tpu.memory_space<semaphore_mem>> -> memref<1x!tpu.dma_semaphore, #tpu.memory_space<semaphore_mem>>
      %109 = tpu.memref_squeeze %108 : memref<1x!tpu.dma_semaphore, #tpu.memory_space<semaphore_mem>> -> memref<!tpu.dma_semaphore, #tpu.memory_space<semaphore_mem>>
      tpu.wait_dma2 semaphore(%109 : memref<!tpu.dma_semaphore, #tpu.memory_space<semaphore_mem>>) src(%106 : memref<1x128xf32, #tpu.memory_space<vmem>>) dst(%107 : memref<1x128xf32, #tpu.memory_space<vmem>>)
      %c8_i32_66 = arith.constant 8 : i32
      %110 = arith.addi %99, %c8_i32_66 : i32
      %c16_i32_67 = arith.constant 16 : i32
      %111 = arith.cmpi slt, %110, %c16_i32_67 : i32
      %112 = arith.extui %111 : i1 to i32
      %c0_i32_68 = arith.constant 0 : i32
      %113 = arith.cmpi ne, %112, %c0_i32_68 : i32
      scf.if %113 {
        %c8_i32_69 = arith.constant 8 : i32
        %114 = arith.addi %99, %c8_i32_69 : i32
        %115 = arith.addi %0, %114 : i32
        %116 = arith.index_cast %115 : i32 to index
        %117 = memref.load %arg1[%116] : memref<16xi32, #tpu.memory_space<smem>>
        %c0_i32_70 = arith.constant 0 : i32
        %118 = arith.maxsi %117, %c0_i32_70 : i32
        %c63_i32_71 = arith.constant 63 : i32
        %119 = arith.minsi %118, %c63_i32_71 : i32
        %c7_i32_72 = arith.constant 7 : i32
        %120 = arith.andi %114, %c7_i32_72 : i32
        %c0_i32_73 = arith.constant 0 : i32
        %121 = tpu.memref_slice %arg2[%119, %c0_i32_73] : memref<64x128xf32, #tpu.memory_space<vmem>> -> memref<1x128xf32, #tpu.memory_space<vmem>>
        %c0_i32_74 = arith.constant 0 : i32
        %122 = tpu.memref_slice %arg3[%114, %c0_i32_74] : memref<16x128xf32, #tpu.memory_space<vmem>> -> memref<1x128xf32, #tpu.memory_space<vmem>>
        %123 = tpu.memref_slice %arg4[%120] : memref<8x!tpu.dma_semaphore, #tpu.memory_space<semaphore_mem>> -> memref<1x!tpu.dma_semaphore, #tpu.memory_space<semaphore_mem>>
        %124 = tpu.memref_squeeze %123 : memref<1x!tpu.dma_semaphore, #tpu.memory_space<semaphore_mem>> -> memref<!tpu.dma_semaphore, #tpu.memory_space<semaphore_mem>>
        tpu.enqueue_dma source(%121 : memref<1x128xf32, #tpu.memory_space<vmem>>) target(%122 : memref<1x128xf32, #tpu.memory_space<vmem>>) target_semaphore(%124 : memref<!tpu.dma_semaphore, #tpu.memory_space<semaphore_mem>>)
      } else {
      }
    }
    %c16_i32_58 = arith.constant 16 : i32
    return
  }
  func.func @transform_0(%arg0: i32, %arg1: memref<16xi32, #tpu.memory_space<smem>>) -> (i32, i32) {
    %c0_i32 = arith.constant 0 : i32
    %c0_i32_0 = arith.constant 0 : i32
    %c0_i32_1 = arith.constant 0 : i32
    return %c0_i32, %c0_i32_0 : i32, i32
  }
  func.func @transform_1(%arg0: i32, %arg1: memref<16xi32, #tpu.memory_space<smem>>) -> (i32, i32) {
    %c0_i32 = arith.constant 0 : i32
    %c0_i32_0 = arith.constant 0 : i32
    return %arg0, %c0_i32 : i32, i32
  }
}

</mosaic_0001>

<bundles_post_ra>
// kernel: tpu_custom_call.1
= control target key start
LH: loop header
LB: loop body
LE: loop exit
PB: predicated region body
PF: predicated region fallthrough
CT: control target
= control target key end

     0   :  { %s886_s9 = smov [#allocation4]   ;;  %s921_s0 = inlined_call_operand.hbm [shape: s32[16], index: 0, kind: input, shape index: {}]   ;;  %s922_s1 = inlined_call_operand.hbm [shape: f32[64,128], index: 1, kind: input, shape index: {}]   ;;  %s923_s2 = inlined_call_operand.hbm [shape: f32[16,128], index: 2, kind: output, shape index: {}]  }
   0x1   :  { %8 = dma.hbm_to_smem %s921_s0, 16, %s886_s9, [#allocation3] }
   0x2   :  { %874 = dma.done.wait [#allocation3], 16 }
   0x3   :  { %875 = vsyncadd [#allocation3], 4294967280 }
   0x4   :  { %10 = sfence }
   0x5   :  { %11 = vsyncpa [#allocation6], 0 }
   0x6   :  { %12 = vsyncpa [#allocation7], 0  ;;  %s887_s12 = smov [#allocation5]  }
   0x7   :  { %s18_s13 = sshll.u32 %s887_s12, 4  ;;  %s19_s13 = int_to_ptr.vmem [resolvable:$true] %s18_s13 }
   0x8   :  { %s838_s14 = scalar_lea.vmem %s19_s13, 1024  ;;  %p843_p1 = scmp.lt.s32.totalorder %s19_s13, %s19_s13 }
   0x9   :  { %p839_p0 = scmp.ne.s32.totalorder %s19_s13, %s838_s14  ;;  %p844_p2 = scmp.lt.s32.totalorder %s838_s14, %s838_s14 }
   0xb   :  { %p845_p3 = por %p844_p2, %p843_p1 }
   0xd   :  { %p846_p4 = pnand %p845_p3, %p839_p0 }
   0xf   :  { %849 = shalt.err (!%p846_p4)
}
  0x10   :  { %s888_s15 = smov 128   ;;  %s889_s16 = smov 8  }
  0x11   :  { %24 = dma.hbm_to_vmem [thread:$0]  %s922_s1, 1024, %s19_s13, [#allocation6], %s888_s15, %s888_s15, %s889_s16  }
  0x12   :  { %876 = dma.done.wait [#allocation6], 1024  }
  0x13   :  { %877 = vsyncadd [#allocation6], 4294966272  ;;  %s29_s18 = sld [smem:[#allocation4]] }
  0x19   :  { %p30_p5 = scmp.gt.s32.totalorder %s29_s18, 0  ;;  %p728_p6 = scmp.lt.s32.totalorder %s29_s18, 63 }
  0x1b   :  { %s925_s18 = smov (!%p30_p5, %s29_s18), 0 }
  0x1c   :  { %s927_s18 = smov (!%p728_p6, %s925_s18), 63 }
  0x1d   :  { %s34_s19 = scalar_lea.vmem [#allocation5], %s927_s18 }
  0x1e   :  { %v53_v0 = vld [vmem:[%s34_s19] sm:$0x1] }
  0x1f   :  { %54 = vst [vmem:[#allocation8] sm:$0x1] %v53_v0 }
  0x20   :  { %80 = vsyncadd [#allocation2], 16  ;;  %s733_s20 = sld [smem:[#allocation4 + $0x1]] }
  0x26   :  { %p83_p7 = scmp.gt.s32.totalorder %s733_s20, 0  ;;  %p734_p8 = scmp.lt.s32.totalorder %s733_s20, 63 }
  0x28   :  { %s929_s20 = smov (!%p83_p7, %s733_s20), 0 }
  0x29   :  { %s931_s20 = smov (!%p734_p8, %s929_s20), 63 }
  0x2a   :  { %s87_s21 = scalar_lea.vmem [#allocation5], %s931_s20 }
  0x2b   :  { %v108_v1 = vld [vmem:[%s87_s21] sm:$0x1] }
  0x2c   :  { %109 = vst [vmem:[#allocation8 + $0x1] sm:$0x1] %v108_v1 }
  0x2d   :  { %135 = vsyncadd [#allocation2 + $0x1], 16  ;;  %s739_s1 = sld [smem:[#allocation4 + $0x2]] }
  0x33   :  { %p138_p9 = scmp.gt.s32.totalorder %s739_s1, 0  ;;  %p740_p10 = scmp.lt.s32.totalorder %s739_s1, 63 }
  0x35   :  { %s933_s1 = smov (!%p138_p9, %s739_s1), 0 }
  0x36   :  { %s935_s1 = smov (!%p740_p10, %s933_s1), 63 }
  0x37   :  { %s142_s22 = scalar_lea.vmem [#allocation5], %s935_s1 }
  0x38   :  { %v163_v2 = vld [vmem:[%s142_s22] sm:$0x1] }
  0x39   :  { %164 = vst [vmem:[#allocation8 + $0x2] sm:$0x1] %v163_v2 }
  0x3a   :  { %190 = vsyncadd [#allocation2 + $0x2], 16  ;;  %s745_s23 = sld [smem:[#allocation4 + $0x3]] }
  0x40   :  { %p193_p11 = scmp.gt.s32.totalorder %s745_s23, 0  ;;  %p746_p12 = scmp.lt.s32.totalorder %s745_s23, 63 }
  0x42   :  { %s937_s23 = smov (!%p193_p11, %s745_s23), 0 }
  0x43   :  { %s939_s23 = smov (!%p746_p12, %s937_s23), 63 }
  0x44   :  { %s197_s24 = scalar_lea.vmem [#allocation5], %s939_s23 }
  0x45   :  { %v218_v3 = vld [vmem:[%s197_s24] sm:$0x1] }
  0x46   :  { %219 = vst [vmem:[#allocation8 + $0x3] sm:$0x1] %v218_v3 }
  0x47   :  { %245 = vsyncadd [#allocation2 + $0x3], 16  ;;  %s751_s25 = sld [smem:[#allocation4 + $0x4]] }
  0x4d   :  { %p248_p13 = scmp.gt.s32.totalorder %s751_s25, 0  ;;  %p752_p0 = scmp.lt.s32.totalorder %s751_s25, 63 }
  0x4f   :  { %s941_s25 = smov (!%p248_p13, %s751_s25), 0 }
  0x50   :  { %s943_s25 = smov (!%p752_p0, %s941_s25), 63 }
  0x51   :  { %s252_s26 = scalar_lea.vmem [#allocation5], %s943_s25 }
  0x52   :  { %v273_v4 = vld [vmem:[%s252_s26] sm:$0x1] }
  0x53   :  { %274 = vst [vmem:[#allocation8 + $0x4] sm:$0x1] %v273_v4 }
  0x54   :  { %300 = vsyncadd [#allocation2 + $0x4], 16  ;;  %s757_s27 = sld [smem:[#allocation4 + $0x5]] }
  0x5a   :  { %p303_p1 = scmp.gt.s32.totalorder %s757_s27, 0  ;;  %p758_p2 = scmp.lt.s32.totalorder %s757_s27, 63 }
  0x5c   :  { %s945_s27 = smov (!%p303_p1, %s757_s27), 0 }
  0x5d   :  { %s947_s27 = smov (!%p758_p2, %s945_s27), 63 }
  0x5e   :  { %s307_s28 = scalar_lea.vmem [#allocation5], %s947_s27 }
  0x5f   :  { %v328_v5 = vld [vmem:[%s307_s28] sm:$0x1] }
  0x60   :  { %329 = vst [vmem:[#allocation8 + $0x5] sm:$0x1] %v328_v5 }
  0x61   :  { %355 = vsyncadd [#allocation2 + $0x5], 16  ;;  %s763_s29 = sld [smem:[#allocation4 + $0x6]] }
  0x67   :  { %p358_p3 = scmp.gt.s32.totalorder %s763_s29, 0  ;;  %p764_p4 = scmp.lt.s32.totalorder %s763_s29, 63 }
  0x69   :  { %s949_s29 = smov (!%p358_p3, %s763_s29), 0 }
  0x6a   :  { %s951_s29 = smov (!%p764_p4, %s949_s29), 63 }
  0x6b   :  { %s362_s30 = scalar_lea.vmem [#allocation5], %s951_s29 }
  0x6c   :  { %v383_v6 = vld [vmem:[%s362_s30] sm:$0x1] }
  0x6d   :  { %384 = vst [vmem:[#allocation8 + $0x6] sm:$0x1] %v383_v6 }
  0x6e   :  { %410 = vsyncadd [#allocation2 + $0x6], 16  ;;  %s769_s3 = sld [smem:[#allocation4 + $0x7]] }
  0x74   :  { %p413_p5 = scmp.gt.s32.totalorder %s769_s3, 0  ;;  %p770_p6 = scmp.lt.s32.totalorder %s769_s3, 63 }
  0x76   :  { %s953_s3 = smov (!%p413_p5, %s769_s3), 0 }
  0x77   :  { %s955_s3 = smov (!%p770_p6, %s953_s3), 63 }
  0x78   :  { %s417_s4 = scalar_lea.vmem [#allocation5], %s955_s3 }
  0x79   :  { %v438_v7 = vld [vmem:[%s417_s4] sm:$0x1] }
  0x7a   :  { %439 = vst [vmem:[#allocation8 + $0x7] sm:$0x1] %v438_v7 }
  0x7b   :  { %465 = vsyncadd [#allocation2 + $0x7], 16  ;;  %s882_s5 = smov 0  }
  0x7c LB: > { %s474_s6 = sand.u32 7, %s884_s5  ;;  %s884_s5 = sphi %s882_s5, %s471_s5  }
  0x7d   : > { %s475_s7 = scalar_lea.sflag [#allocation2], %s474_s6 }
  0x7e   : > { %878 = dma.done.wait %s475_s7, 16 }
  0x7f   : > { %879 = vsyncadd %s475_s7, 4294967280  ;;  %s479_s8 = sadd.s32 8, %s884_s5 }
  0x80   : > { %p775_p7 = scmp.ge.s32.totalorder %s479_s8, 16 }
  0x81   : > { %s485_s9 = sld [smem:[#allocation4 + %s479_s8]] (!%p775_p7)  ;;  %s490_s10 = sand.u32 (!%p775_p7), 7, %s479_s8 }
  0x82   : > { %483 = sbr.rel (%p775_p7) target bundleno = 143 (0x8f), region = 260  ;;  %s645_s12 = scalar_lea.vmem (!%p775_p7), [#allocation8], %s884_s5 }
  0x83   : > { %s493_s13 = scalar_lea.sflag (!%p775_p7), [#allocation2], %s490_s10 }
  0x87   : > { %p486_p8 = scmp.gt.s32.totalorder %s485_s9, 0  ;;  %p776_p9 = scmp.lt.s32.totalorder %s485_s9, 63 }
  0x89   : > { %s957_s9 = smov (!%p486_p8, %s485_s9), 0 }
  0x8a   : > { %s959_s9 = smov (!%p776_p9, %s957_s9), 63 }
  0x8b   : > { %s491_s11 = scalar_lea.vmem [#allocation5], %s959_s9 }
  0x8c   : > { %v512_v8 = vld [vmem:[%s491_s11] sm:$0x1] }
  0x8d   : > { %782 = vst [vmem:[%s645_s12 + $0x8] sm:$0x1] %v512_v8 }
  0x8e   : > { %539 = vsyncadd %s493_s13, 16 }
  0x8f PF: > { %s471_s5 = sadd.s32 1, %s884_s5  }
  0x90   : > { %p468_p10 = scmp.ge.s32.totalorder %s471_s5, 16  }
  0x91   :  { %s890_s14 = smov (%p468_p10), [#allocation8]  }
  0x92   :  { %470 = sbr.rel (!%p468_p10) target bundleno = 124 (0x7c), region = 432  ;;  %s545_s0 = sshll.u32 (%p468_p10), %s890_s14, 4  ;;  %s546_s0 = int_to_ptr.vmem [resolvable:$true] %s545_s0 }
  0x93   :  { %s850_s17 = scalar_lea.vmem (%p468_p10), %s546_s0, 256  ;;  %p855_p12 = scmp.lt.s32.totalorder (%p468_p10), %s546_s0, %s546_s0 }
  0x94   :  { %p851_p11 = scmp.ne.s32.totalorder (%p468_p10), %s546_s0, %s850_s17  ;;  %p856_p13 = scmp.lt.s32.totalorder (%p468_p10), %s850_s17, %s850_s17 }
  0x96   :  { %p857_p0 = por (%p468_p10), %p856_p13, %p855_p12 }
  0x98   :  { %p858_p1 = pnand %p857_p0, %p851_p11 }
  0x9a   :  { %861 = shalt.err (!%p858_p1)
}
  0x9b   :  { %551 = dma.vmem_to_hbm [thread:$0]  %s546_s0, 256, %s923_s2, [#allocation7], %s888_s15, %s888_s15, %s889_s16  }
  0x9c   :  { %880 = dma.done.wait [#allocation7], 256  }
  0x9d   :  { %881 = vsyncadd [#allocation7], 4294967040 }
  0x9e   :  { %555 = vsyncpa [#allocation6], 1 }
  0x9f   :  { %556 = vsyncpa [#allocation7], 1 }
  0xa0   :  { %557 = vsyncmov [#allocation2] }
  0xa3   :  { %s558_s20 = vpop.sfrf %557 }
  0xa4   :  { %p783_p2 = scmp.ne.s32.totalorder %s558_s20, 0 }
  0xa6   :  { %562 = shalt.err (%p783_p2)  }
  0xa7   :  { %564 = vsyncmov [#allocation2 + $0x1] }
  0xaa   :  { %s565_s21 = vpop.sfrf %564 }
  0xab   :  { %p784_p3 = scmp.ne.s32.totalorder %s565_s21, 0 }
  0xad   :  { %569 = shalt.err (%p784_p3)  }
  0xae   :  { %571 = vsyncmov [#allocation2 + $0x2] }
  0xb1   :  { %s572_s1 = vpop.sfrf %571 }
  0xb2   :  { %p785_p4 = scmp.ne.s32.totalorder %s572_s1, 0 }
  0xb4   :  { %576 = shalt.err (%p785_p4)  }
  0xb5   :  { %578 = vsyncmov [#allocation2 + $0x3] }
  0xb8   :  { %s579_s22 = vpop.sfrf %578 }
  0xb9   :  { %p786_p5 = scmp.ne.s32.totalorder %s579_s22, 0 }
  0xbb   :  { %583 = shalt.err (%p786_p5)  }
  0xbc   :  { %585 = vsyncmov [#allocation2 + $0x4] }
  0xbf   :  { %s586_s2 = vpop.sfrf %585 }
  0xc0   :  { %p787_p6 = scmp.ne.s32.totalorder %s586_s2, 0 }
  0xc2   :  { %590 = shalt.err (%p787_p6)  }
  0xc3   :  { %592 = vsyncmov [#allocation2 + $0x5] }
  0xc6   :  { %s593_s15 = vpop.sfrf %592 }
  0xc7   :  { %p788_p7 = scmp.ne.s32.totalorder %s593_s15, 0 }
  0xc9   :  { %597 = shalt.err (%p788_p7)  }
  0xca   :  { %599 = vsyncmov [#allocation2 + $0x6] }
  0xcd   :  { %s600_s16 = vpop.sfrf %599 }
  0xce   :  { %p789_p8 = scmp.ne.s32.totalorder %s600_s16, 0 }
  0xd0   :  { %604 = shalt.err (%p789_p8)  }
  0xd1   :  { %606 = vsyncmov [#allocation2 + $0x7] }
  0xd4   :  { %s607_s23 = vpop.sfrf %606 }
  0xd5   :  { %p790_p9 = scmp.ne.s32.totalorder %s607_s23, 0 }
  0xd7   :  { %611 = shalt.err (%p790_p9)  }

</bundles_post_ra>
